<compile_context>
chip_gen: v7x
topology: tpu7x:2x2x1
jax: 0.10.0
libtpu: 0.0.40
codegen_flags: <defaults>
</compile_context>

<pallas_src>
import functools

import jax
import jax.numpy as jnp
import numpy as np
from jax import lax
from jax.experimental import pallas as pl
from jax.experimental.pallas import tpu as pltpu

_LN_EPS = 1e-5
_MASK_VALUE = -1e30
# Set to jnp.bfloat16 on v5e/v6e/v7x for ~2x+ MXU throughput and half the
# HBM/VMEM traffic (accumulation stays f32 via preferred_element_type).  Kept
# at None (input dtype) so the small-shape numerical check stays tight.
_MXU_COMPUTE_DTYPE = None


def _round_up(x, m):
    return (x + m - 1) // m * m


# ---------------------------------------------------------------------------
# Tiled matmul (+ bias + optional QuickGELU + optional fused residual add):
#   y = act(x @ w + b) [+ residual]
# ---------------------------------------------------------------------------
def _matmul_kernel(x_ref, w_ref, b_ref, *rest, activation, has_residual):
    if has_residual:
        r_ref, o_ref, acc_ref = rest
    else:
        r_ref = None
        o_ref, acc_ref = rest

    k = pl.program_id(2)

    @pl.when(k == 0)
    def _():
        acc_ref[...] = jnp.zeros_like(acc_ref)

    acc_ref[...] += jnp.dot(x_ref[...], w_ref[...],
                            preferred_element_type=jnp.float32)

    @pl.when(k == pl.num_programs(2) - 1)
    def _():
        out = acc_ref[...] + b_ref[...].astype(jnp.float32)
        if activation == "quick_gelu":
            out = out * jax.nn.sigmoid(1.702 * out)
        if has_residual:
            out = out + r_ref[...].astype(jnp.float32)
        o_ref[...] = out.astype(o_ref.dtype)


def pallas_linear(x2d, w_kn, bias=None, *, activation=None, residual=None,
                  tm_max=256, tn_max=512, tk_max=512,
                  compute_dtype=_MXU_COMPUTE_DTYPE):
    """y = activation(x2d @ w_kn + bias) [+ residual].

    x2d: (M, K), w_kn: (K, N) -- weight kept in (in, out) layout, no transpose.
    Zero-pads M to a multiple of 8 and K/N to multiples of 128 (lane-dense)
    when needed, then tiles over an (M, N, K) grid with an f32 VMEM accumulator.
    The bias add, QuickGELU and residual add run in the writeback epilogue.
    """
    M, K = x2d.shape
    K2, N = w_kn.shape
    assert K == K2
    out_dtype = x2d.dtype
    if bias is None:
        bias = jnp.zeros((N,), out_dtype)
    if compute_dtype is not None:
        x2d = x2d.astype(compute_dtype)
        w_kn = w_kn.astype(compute_dtype)

    tm = min(_round_up(M, 8), tm_max)
    tn = min(_round_up(N, 128), tn_max)
    tk = min(_round_up(K, 128), tk_max)
    Mp = _round_up(M, tm)
    Np = _round_up(N, tn)
    Kp = _round_up(K, tk)

    def pad2(a, rows, cols):
        if a.shape[0] == rows and a.shape[1] == cols:
            return a
        return jnp.pad(a, ((0, rows - a.shape[0]), (0, cols - a.shape[1])))

    xp = pad2(x2d, Mp, Kp)
    wp = pad2(w_kn, Kp, Np)
    bp = pad2(bias.reshape(1, N), 1, Np)

    in_bytes = xp.dtype.itemsize
    out_bytes = jnp.dtype(out_dtype).itemsize
    # double-buffered inputs + f32 accumulator + double-buffered output
    need = (2 * (tm * tk + tk * tn + tn) * in_bytes
            + tm * tn * 4 + 2 * tm * tn * out_bytes)

    in_specs = [
        pl.BlockSpec((tm, tk), lambda i, j, k: (i, k)),
        pl.BlockSpec((tk, tn), lambda i, j, k: (k, j)),
        pl.BlockSpec((1, tn), lambda i, j, k: (0, j)),
    ]
    operands = [xp, wp, bp]
    has_residual = residual is not None
    if has_residual:
        rp = pad2(residual, Mp, Np)
        in_specs.append(pl.BlockSpec((tm, tn), lambda i, j, k: (i, j)))
        operands.append(rp)
        need += 2 * tm * tn * rp.dtype.itemsize

    vmem_limit = int(min(max(2 * need, 4 << 20), 48 << 20))

    grid = (Mp // tm, Np // tn, Kp // tk)
    out = pl.pallas_call(
        functools.partial(_matmul_kernel, activation=activation,
                          has_residual=has_residual),
        out_shape=jax.ShapeDtypeStruct((Mp, Np), out_dtype),
        grid=grid,
        in_specs=in_specs,
        out_specs=pl.BlockSpec((tm, tn), lambda i, j, k: (i, j)),
        scratch_shapes=[pltpu.VMEM((tm, tn), jnp.float32)],
        compiler_params=pltpu.CompilerParams(
            dimension_semantics=("parallel", "parallel", "arbitrary"),
            vmem_limit_bytes=vmem_limit),
    )(*operands)
    if Mp == M and Np == N:
        return out
    return out[:M, :N]


# ---------------------------------------------------------------------------
# Row-wise LayerNorm kernel
# ---------------------------------------------------------------------------
def _layernorm_kernel(x_ref, g_ref, b_ref, o_ref, *, eps):
    x = x_ref[...].astype(jnp.float32)
    mean = jnp.mean(x, axis=-1, keepdims=True)
    var = jnp.mean(jnp.square(x - mean), axis=-1, keepdims=True)
    y = (x - mean) * lax.rsqrt(var + eps)
    y = y * g_ref[...].astype(jnp.float32) + b_ref[...].astype(jnp.float32)
    o_ref[...] = y.astype(o_ref.dtype)


def pallas_layernorm(x2d, gamma, beta, *, eps=_LN_EPS, tm_max=256):
    M, D = x2d.shape
    tm = min(_round_up(M, 8), tm_max)
    Mp = _round_up(M, tm)
    xp = x2d if Mp == M else jnp.pad(x2d, ((0, Mp - M), (0, 0)))
    g2d = gamma.reshape(1, D)
    b2d = beta.reshape(1, D)
    out = pl.pallas_call(
        functools.partial(_layernorm_kernel, eps=eps),
        out_shape=jax.ShapeDtypeStruct((Mp, D), x2d.dtype),
        grid=(Mp // tm,),
        in_specs=[
            pl.BlockSpec((tm, D), lambda i: (i, 0)),
            pl.BlockSpec((1, D), lambda i: (0, 0)),
            pl.BlockSpec((1, D), lambda i: (0, 0)),
        ],
        out_specs=pl.BlockSpec((tm, D), lambda i: (i, 0)),
        compiler_params=pltpu.CompilerParams(
            dimension_semantics=("parallel",)),
    )(xp, g2d, b2d)
    return out if Mp == M else out[:M]


# ---------------------------------------------------------------------------
# Causal softmax attention kernel: one grid step per batch element, all heads
# processed inside the step (amortizes per-grid-step overhead over H heads).
# ---------------------------------------------------------------------------
def _attention_kernel(q_ref, k_ref, v_ref, o_ref, *, scale):
    q = q_ref[0].astype(jnp.float32) * scale          # (H, S, Dh)
    k = k_ref[0].astype(jnp.float32)
    v = v_ref[0].astype(jnp.float32)
    s = jnp.einsum("hqd,hkd->hqk", q, k,
                   preferred_element_type=jnp.float32)            # (H, S, S)
    S = s.shape[-1]
    row = lax.broadcasted_iota(jnp.int32, (S, S), 0)
    col = lax.broadcasted_iota(jnp.int32, (S, S), 1)
    s = jnp.where((col <= row)[None], s, _MASK_VALUE)             # causal mask
    s = s - jnp.max(s, axis=-1, keepdims=True)
    p = jnp.exp(s)
    p = p / jnp.sum(p, axis=-1, keepdims=True)
    o = jnp.einsum("hqk,hkd->hqd", p, v,
                   preferred_element_type=jnp.float32)
    o_ref[0] = o.astype(o_ref.dtype)


def pallas_causal_attention(q, k, v):
    """q, k, v: (B, H, S, Dh) -> (B, H, S, Dh)."""
    B, H, S, Dh = q.shape
    scale = 1.0 / float(np.sqrt(Dh))
    spec = pl.BlockSpec((1, H, S, Dh), lambda b: (b, 0, 0, 0))
    return pl.pallas_call(
        functools.partial(_attention_kernel, scale=scale),
        out_shape=jax.ShapeDtypeStruct((B, H, S, Dh), q.dtype),
        grid=(B,),
        in_specs=[spec, spec, spec],
        out_specs=spec,
        compiler_params=pltpu.CompilerParams(
            dimension_semantics=("parallel",)),
    )(q, k, v)


# ---------------------------------------------------------------------------
# CLIP text transformer built from the kernels above
# ---------------------------------------------------------------------------
def transformer_block(x2d, p, *, B, S, n_heads):
    W = x2d.shape[-1]
    Dh = W // n_heads

    # --- causal multi-head self-attention ---
    h = pallas_layernorm(x2d, p["ln1_g"], p["ln1_b"])
    qkv = pallas_linear(h, p["attn_in_w"], p["attn_in_b"])        # (B*S, 3W)
    q, k, v = jnp.split(qkv, 3, axis=-1)

    def to_heads(t):  # (B*S, W) -> (B, H, S, Dh)
        return t.reshape(B, S, n_heads, Dh).transpose(0, 2, 1, 3)

    o = pallas_causal_attention(to_heads(q), to_heads(k), to_heads(v))
    o = o.transpose(0, 2, 1, 3).reshape(B * S, W)
    # output projection with the residual add fused into the epilogue
    x2d = pallas_linear(o, p["attn_out_w"], p["attn_out_b"], residual=x2d)

    # --- MLP with QuickGELU (fused) and fused residual add ---
    h = pallas_layernorm(x2d, p["ln2_g"], p["ln2_b"])
    h = pallas_linear(h, p["fc_w"], p["fc_b"], activation="quick_gelu")
    x2d = pallas_linear(h, p["proj_w"], p["proj_b"], residual=x2d)
    return x2d


@functools.partial(jax.jit, static_argnames=("n_heads",))
def clip_text_encode(params, input_ids, *, n_heads):
    """Pallas equivalent of CLIP_Text_Encoder.forward, starting from input_ids."""
    B, S = input_ids.shape
    x = jnp.take(params["token_embedding"], input_ids, axis=0)    # (B, S, W)
    x = x + params["positional_embedding"][None]
    W = x.shape[-1]
    x2d = x.reshape(B * S, W)
    for p in params["layers"]:
        x2d = transformer_block(x2d, p, B=B, S=S, n_heads=n_heads)
    x2d = pallas_layernorm(x2d, params["ln_final_g"], params["ln_final_b"])
    x = x2d.reshape(B, S, W)
    eot = jnp.argmax(input_ids, axis=-1)                          # EOT token pos
    pooled = x[jnp.arange(B), eot]                                # (B, W)
    feats = pallas_linear(pooled, params["text_projection"])      # (B, E)
    return feats[None]                                            # .unsqueeze(0)


# ---------------------------------------------------------------------------
# Pure-JAX reference (mirrors the same math) for correctness checking
# ---------------------------------------------------------------------------
def _layernorm_ref(x, g, b, eps=_LN_EPS):
    mean = jnp.mean(x, axis=-1, keepdims=True)
    var = jnp.mean(jnp.square(x - mean), axis=-1, keepdims=True)
    return (x - mean) * lax.rsqrt(var + eps) * g + b


def clip_text_encode_ref(params, input_ids, *, n_heads):
    B, S = input_ids.shape
    x = jnp.take(params["token_embedding"], input_ids, axis=0)
    x = x + params["positional_embedding"][None]
    W = x.shape[-1]
    Dh = W // n_heads
    row = lax.broadcasted_iota(jnp.int32, (S, S), 0)
    col = lax.broadcasted_iota(jnp.int32, (S, S), 1)
    causal = col <= row
    for p in params["layers"]:
        h = _layernorm_ref(x, p["ln1_g"], p["ln1_b"])
        qkv = h @ p["attn_in_w"] + p["attn_in_b"]
        q, k, v = jnp.split(qkv, 3, axis=-1)
        q = q.reshape(B, S, n_heads, Dh).transpose(0, 2, 1, 3)
        k = k.reshape(B, S, n_heads, Dh).transpose(0, 2, 1, 3)
        v = v.reshape(B, S, n_heads, Dh).transpose(0, 2, 1, 3)
        s = jnp.einsum("bhqd,bhkd->bhqk", q, k) / np.sqrt(Dh)
        s = jnp.where(causal[None, None], s, _MASK_VALUE)
        s = s - jnp.max(s, axis=-1, keepdims=True)
        pr = jnp.exp(s)
        pr = pr / jnp.sum(pr, axis=-1, keepdims=True)
        o = jnp.einsum("bhqk,bhkd->bhqd", pr, v)
        o = o.transpose(0, 2, 1, 3).reshape(B, S, W)
        x = x + (o @ p["attn_out_w"] + p["attn_out_b"])
        h = _layernorm_ref(x, p["ln2_g"], p["ln2_b"])
        h = h @ p["fc_w"] + p["fc_b"]
        h = h * jax.nn.sigmoid(1.702 * h)
        h = h @ p["proj_w"] + p["proj_b"]
        x = x + h
    x = _layernorm_ref(x, params["ln_final_g"], params["ln_final_b"])
    eot = jnp.argmax(input_ids, axis=-1)
    pooled = x[jnp.arange(B), eot]
    return (pooled @ params["text_projection"])[None]


# ---------------------------------------------------------------------------
# Parameter construction (random stand-ins for the pretrained checkpoint)
# ---------------------------------------------------------------------------
def init_params(key, *, vocab, seq, width, layers, embed_dim,
                dtype=jnp.float32):
    def normal(k, shape, scale=0.02):
        return scale * jax.random.normal(k, shape, dtype)

    keys = jax.random.split(key, 3 + layers)
    params = {
        "token_embedding": normal(keys[0], (vocab, width)),
        "positional_embedding": normal(keys[1], (seq, width)),
        "ln_final_g": jnp.ones((width,), dtype),
        "ln_final_b": jnp.zeros((width,), dtype),
        # All weights stored in (in_features, out_features) layout so the
        # kernel never materializes a transpose.
        "text_projection": normal(keys[2], (width, embed_dim)),
        "layers": [],
    }
    for l in range(layers):
        lk = jax.random.split(keys[3 + l], 8)
        params["layers"].append({
            "ln1_g": jnp.ones((width,), dtype),
            "ln1_b": jnp.zeros((width,), dtype),
            "attn_in_w": normal(lk[0], (width, 3 * width)),
            "attn_in_b": normal(lk[1], (3 * width,)),
            "attn_out_w": normal(lk[2], (width, width)),
            "attn_out_b": normal(lk[3], (width,)),
            "ln2_g": jnp.ones((width,), dtype),
            "ln2_b": jnp.zeros((width,), dtype),
            "fc_w": normal(lk[4], (width, 4 * width)),
            "fc_b": normal(lk[5], (4 * width,)),
            "proj_w": normal(lk[6], (4 * width, width)),
            "proj_b": normal(lk[7], (width,)),
        })
    return params


# ---------------------------------------------------------------------------
# main
# ---------------------------------------------------------------------------
if __name__ == "__main__":
    key = jax.random.PRNGKey(0)
    kp, kt = jax.random.split(key)

    # Small-scale CLIP text tower (real ViT-L/14: vocab 49408, seq 77,
    # width 768, 12 heads, 12 layers, embed 768).
    vocab, seq, width, heads, layers, embed_dim = 64, 8, 32, 2, 2, 32
    bsz = 2

    params = init_params(kp, vocab=vocab, seq=seq, width=width,
                         layers=layers, embed_dim=embed_dim)
    # TODO(synk): CLIPProcessor tokenization (str -> "max_length"-padded ids)
    # runs on host; deterministic random token ids stand in for it here.
    input_ids = jax.random.randint(kt, (bsz, seq), 0, vocab, dtype=jnp.int32)

    out = clip_text_encode(params, input_ids, n_heads=heads)
    out = jax.block_until_ready(out)

    ref = clip_text_encode_ref(params, input_ids, n_heads=heads)
    assert out.shape == (1, bsz, embed_dim), out.shape
    np.testing.assert_allclose(np.asarray(out), np.asarray(ref),
                               rtol=2e-2, atol=2e-3)
    print("KERNEL_OK")
</pallas_src>

<mosaic_0001>
module attributes {stable_mosaic.version = 11 : i64} {
  func.func @_layernorm_kernel(%arg0: i32, %arg1: memref<16x32xf32, #tpu.memory_space<vmem>>, %arg2: memref<1x32xf32, #tpu.memory_space<vmem>>, %arg3: memref<1x32xf32, #tpu.memory_space<vmem>>, %arg4: memref<16x32xf32, #tpu.memory_space<vmem>>) attributes {dimension_semantics = [#tpu.dimension_semantics<parallel>], iteration_bounds = array<i64: 1>, scalar_prefetch = 0 : i64, scratch_operands = 0 : i64, tpu.core_type = #tpu.core_type<tc>, window_params = [{transform_indices = @transform_0, window_bounds = array<i64: 16, 32>}, {pipeline_mode = #tpu.pipeline_mode<synchronous>, transform_indices = @transform_1, window_bounds = array<i64: 1, 32>}, {pipeline_mode = #tpu.pipeline_mode<synchronous>, transform_indices = @transform_2, window_bounds = array<i64: 1, 32>}, {transform_indices = @transform_3, window_bounds = array<i64: 16, 32>}]} {
    %c0 = arith.constant 0 : index
    %c0_0 = arith.constant 0 : index
    %0 = vector.load %arg1[%c0, %c0_0] : memref<16x32xf32, #tpu.memory_space<vmem>>, vector<16x32xf32>
    %cst = arith.constant dense<0.000000e+00> : vector<16xf32>
    %1 = vector.multi_reduction <add>, %0, %cst [1] : vector<16x32xf32> to vector<16xf32>
    %2 = vector.shape_cast %1 : vector<16xf32> to vector<16x1xf32>
    %cst_1 = arith.constant 3.200000e+01 : f32
    %3 = vector.broadcast %cst_1 : f32 to vector<16x1xf32>
    %4 = arith.divf %2, %3 : vector<16x1xf32>
    %5 = vector.broadcast %4 : vector<16x1xf32> to vector<16x32xf32>
    %6 = arith.subf %0, %5 : vector<16x32xf32>
    %7 = arith.mulf %6, %6 : vector<16x32xf32>
    %cst_2 = arith.constant dense<0.000000e+00> : vector<16xf32>
    %8 = vector.multi_reduction <add>, %7, %cst_2 [1] : vector<16x32xf32> to vector<16xf32>
    %9 = vector.shape_cast %8 : vector<16xf32> to vector<16x1xf32>
    %cst_3 = arith.constant 3.200000e+01 : f32
    %10 = vector.broadcast %cst_3 : f32 to vector<16x1xf32>
    %11 = arith.divf %9, %10 : vector<16x1xf32>
    %12 = vector.broadcast %4 : vector<16x1xf32> to vector<16x32xf32>
    %13 = arith.subf %0, %12 : vector<16x32xf32>
    %cst_4 = arith.constant 9.99999974E-6 : f32
    %14 = vector.broadcast %cst_4 : f32 to vector<16x1xf32>
    %15 = arith.addf %11, %14 : vector<16x1xf32>
    %16 = math.rsqrt %15 : vector<16x1xf32>
    %17 = vector.broadcast %16 : vector<16x1xf32> to vector<16x32xf32>
    %18 = arith.mulf %13, %17 : vector<16x32xf32>
    %c0_5 = arith.constant 0 : index
    %c0_6 = arith.constant 0 : index
    %19 = vector.load %arg2[%c0_5, %c0_6] : memref<1x32xf32, #tpu.memory_space<vmem>>, vector<1x32xf32>
    %20 = vector.broadcast %19 : vector<1x32xf32> to vector<16x32xf32>
    %21 = arith.mulf %18, %20 : vector<16x32xf32>
    %c0_7 = arith.constant 0 : index
    %c0_8 = arith.constant 0 : index
    %22 = vector.load %arg3[%c0_7, %c0_8] : memref<1x32xf32, #tpu.memory_space<vmem>>, vector<1x32xf32>
    %23 = vector.broadcast %22 : vector<1x32xf32> to vector<16x32xf32>
    %24 = arith.addf %21, %23 : vector<16x32xf32>
    %c0_9 = arith.constant 0 : index
    %c0_10 = arith.constant 0 : index
    %25 = vector.load %arg4[%c0_9, %c0_10] : memref<16x32xf32, #tpu.memory_space<vmem>>, vector<16x32xf32>
    tpu.vector_store %arg4[%c0_9, %c0_10], %24 {strides = array<i32>} : memref<16x32xf32, #tpu.memory_space<vmem>>, vector<16x32xf32>,
    return
  }
  func.func @transform_0(%arg0: i32) -> (i32, i32) {
    %c0_i32 = arith.constant 0 : i32
    %c0_i32_0 = arith.constant 0 : i32
    return %arg0, %c0_i32 : i32, i32
  }
  func.func @transform_1(%arg0: i32) -> (i32, i32) {
    %c0_i32 = arith.constant 0 : i32
    %c0_i32_0 = arith.constant 0 : i32
    %c0_i32_1 = arith.constant 0 : i32
    return %c0_i32, %c0_i32_0 : i32, i32
  }
  func.func @transform_2(%arg0: i32) -> (i32, i32) {
    %c0_i32 = arith.constant 0 : i32
    %c0_i32_0 = arith.constant 0 : i32
    %c0_i32_1 = arith.constant 0 : i32
    return %c0_i32, %c0_i32_0 : i32, i32
  }
  func.func @transform_3(%arg0: i32) -> (i32, i32) {
    %c0_i32 = arith.constant 0 : i32
    %c0_i32_0 = arith.constant 0 : i32
    return %arg0, %c0_i32 : i32, i32
  }
}

module attributes {stable_mosaic.version = 11 : i64} {
  func.func @_matmul_kernel(%arg0: i32, %arg1: i32, %arg2: i32, %arg3: memref<16x128xf32, #tpu.memory_space<vmem>>, %arg4: memref<128x128xf32, #tpu.memory_space<vmem>>, %arg5: memref<1x128xf32, #tpu.memory_space<vmem>>, %arg6: memref<16x128xf32, #tpu.memory_space<vmem>>, %arg7: memref<16x128xf32, #tpu.memory_space<vmem>>) attributes {dimension_semantics = [#tpu.dimension_semantics<parallel>, #tpu.dimension_semantics<parallel>, #tpu.dimension_semantics<arbitrary>], iteration_bounds = array<i64: 1, 1, 1>, scalar_prefetch = 0 : i64, scratch_operands = 1 : i64, tpu.core_type = #tpu.core_type<tc>, window_params = [{transform_indices = @transform_0, window_bounds = array<i64: 16, 128>}, {transform_indices = @transform_1, window_bounds = array<i64: 128, 128>}, {transform_indices = @transform_2, window_bounds = array<i64: 1, 128>}, {transform_indices = @transform_3, window_bounds = array<i64: 16, 128>}]} {
    %c0_i32 = arith.constant 0 : i32
    %0 = arith.cmpi eq, %arg2, %c0_i32 : i32
    %1 = arith.extui %0 : i1 to i32
    %c0_i32_0 = arith.constant 0 : i32
    %2 = arith.cmpi ne, %1, %c0_i32_0 : i32
    scf.if %2 {
      %cst_10 = arith.constant 0.000000e+00 : f32
      %12 = vector.broadcast %cst_10 : f32 to vector<16x128xf32>
      %c0_11 = arith.constant 0 : index
      %c0_12 = arith.constant 0 : index
      %13 = vector.load %arg7[%c0_11, %c0_12] : memref<16x128xf32, #tpu.memory_space<vmem>>, vector<16x128xf32>
      tpu.vector_store %arg7[%c0_11, %c0_12], %12 {strides = array<i32>} : memref<16x128xf32, #tpu.memory_space<vmem>>, vector<16x128xf32>,
    } else {
    }
    %c0 = arith.constant 0 : index
    %c0_1 = arith.constant 0 : index
    %3 = vector.load %arg7[%c0, %c0_1] : memref<16x128xf32, #tpu.memory_space<vmem>>, vector<16x128xf32>
    %c0_2 = arith.constant 0 : index
    %c0_3 = arith.constant 0 : index
    %4 = vector.load %arg3[%c0_2, %c0_3] : memref<16x128xf32, #tpu.memory_space<vmem>>, vector<16x128xf32>
    %c0_4 = arith.constant 0 : index
    %c0_5 = arith.constant 0 : index
    %5 = vector.load %arg4[%c0_4, %c0_5] : memref<128x128xf32, #tpu.memory_space<vmem>>, vector<128x128xf32>
    %cst = arith.constant dense<0.000000e+00> : vector<16x128xf32>
    %6 = tpu.matmul %4, %5, %cst {dimension_numbers = #tpu.dot_dimension_numbers<[1], [0], [0], [1], [0, 0, 1, 1], [], []>} : vector<16x128xf32>, vector<128x128xf32>, vector<16x128xf32> -> vector<16x128xf32>
    %7 = arith.addf %3, %6 : vector<16x128xf32>
    %c0_6 = arith.constant 0 : index
    %c0_7 = arith.constant 0 : index
    %8 = vector.load %arg7[%c0_6, %c0_7] : memref<16x128xf32, #tpu.memory_space<vmem>>, vector<16x128xf32>
    tpu.vector_store %arg7[%c0_6, %c0_7], %7 {strides = array<i32>} : memref<16x128xf32, #tpu.memory_space<vmem>>, vector<16x128xf32>,
    %c0_i32_8 = arith.constant 0 : i32
    %9 = arith.cmpi eq, %arg2, %c0_i32_8 : i32
    %10 = arith.extui %9 : i1 to i32
    %c0_i32_9 = arith.constant 0 : i32
    %11 = arith.cmpi ne, %10, %c0_i32_9 : i32
    scf.if %11 {
      %c0_10 = arith.constant 0 : index
      %c0_11 = arith.constant 0 : index
      %12 = vector.load %arg7[%c0_10, %c0_11] : memref<16x128xf32, #tpu.memory_space<vmem>>, vector<16x128xf32>
      %c0_12 = arith.constant 0 : index
      %c0_13 = arith.constant 0 : index
      %13 = vector.load %arg5[%c0_12, %c0_13] : memref<1x128xf32, #tpu.memory_space<vmem>>, vector<1x128xf32>
      %14 = vector.broadcast %13 : vector<1x128xf32> to vector<16x128xf32>
      %15 = arith.addf %12, %14 : vector<16x128xf32>
      %c0_14 = arith.constant 0 : index
      %c0_15 = arith.constant 0 : index
      %16 = vector.load %arg6[%c0_14, %c0_15] : memref<16x128xf32, #tpu.memory_space<vmem>>, vector<16x128xf32>
      tpu.vector_store %arg6[%c0_14, %c0_15], %15 {strides = array<i32>} : memref<16x128xf32, #tpu.memory_space<vmem>>, vector<16x128xf32>,
    } else {
    }
    return
  }
  func.func @transform_0(%arg0: i32, %arg1: i32, %arg2: i32) -> (i32, i32) {
    %c0_i32 = arith.constant 0 : i32
    return %arg0, %arg2 : i32, i32
  }
  func.func @transform_1(%arg0: i32, %arg1: i32, %arg2: i32) -> (i32, i32) {
    %c0_i32 = arith.constant 0 : i32
    return %arg2, %arg1 : i32, i32
  }
  func.func @transform_2(%arg0: i32, %arg1: i32, %arg2: i32) -> (i32, i32) {
    %c0_i32 = arith.constant 0 : i32
    %c0_i32_0 = arith.constant 0 : i32
    return %c0_i32, %arg1 : i32, i32
  }
  func.func @transform_3(%arg0: i32, %arg1: i32, %arg2: i32) -> (i32, i32) {
    %c0_i32 = arith.constant 0 : i32
    return %arg0, %arg1 : i32, i32
  }
}

module attributes {stable_mosaic.version = 11 : i64} {
  func.func @_attention_kernel(%arg0: i32, %arg1: memref<1x2x8x16xf32, #tpu.memory_space<vmem>>, %arg2: memref<1x2x8x16xf32, #tpu.memory_space<vmem>>, %arg3: memref<1x2x8x16xf32, #tpu.memory_space<vmem>>, %arg4: memref<1x2x8x16xf32, #tpu.memory_space<vmem>>) attributes {dimension_semantics = [#tpu.dimension_semantics<parallel>], iteration_bounds = array<i64: 2>, scalar_prefetch = 0 : i64, scratch_operands = 0 : i64, tpu.core_type = #tpu.core_type<tc>, window_params = [{transform_indices = @transform_0, window_bounds = array<i64: 1, 2, 8, 16>}, {transform_indices = @transform_1, window_bounds = array<i64: 1, 2, 8, 16>}, {transform_indices = @transform_2, window_bounds = array<i64: 1, 2, 8, 16>}, {transform_indices = @transform_3, window_bounds = array<i64: 1, 2, 8, 16>}]} {
    %c0 = arith.constant 0 : index
    %c0_0 = arith.constant 0 : index
    %c0_1 = arith.constant 0 : index
    %c0_2 = arith.constant 0 : index
    %0 = vector.load %arg1[%c0, %c0_0, %c0_1, %c0_2] : memref<1x2x8x16xf32, #tpu.memory_space<vmem>>, vector<1x2x8x16xf32>
    %1 = vector.shape_cast %0 : vector<1x2x8x16xf32> to vector<2x8x16xf32>
    %cst = arith.constant 2.500000e-01 : f32
    %2 = vector.broadcast %cst : f32 to vector<2x8x16xf32>
    %3 = arith.mulf %1, %2 : vector<2x8x16xf32>
    %c0_3 = arith.constant 0 : index
    %c0_4 = arith.constant 0 : index
    %c0_5 = arith.constant 0 : index
    %c0_6 = arith.constant 0 : index
    %4 = vector.load %arg2[%c0_3, %c0_4, %c0_5, %c0_6] : memref<1x2x8x16xf32, #tpu.memory_space<vmem>>, vector<1x2x8x16xf32>
    %5 = vector.shape_cast %4 : vector<1x2x8x16xf32> to vector<2x8x16xf32>
    %c0_7 = arith.constant 0 : index
    %c0_8 = arith.constant 0 : index
    %c0_9 = arith.constant 0 : index
    %c0_10 = arith.constant 0 : index
    %6 = vector.load %arg3[%c0_7, %c0_8, %c0_9, %c0_10] : memref<1x2x8x16xf32, #tpu.memory_space<vmem>>, vector<1x2x8x16xf32>
    %7 = vector.shape_cast %6 : vector<1x2x8x16xf32> to vector<2x8x16xf32>
    "tpu.trace_start"() <{level = 10 : i32, message = "hqd,hkd->hqk"}> : () -> ()
    %cst_11 = arith.constant dense<0.000000e+00> : vector<2x8x8xf32>
    %8 = tpu.matmul %3, %5, %cst_11 {dimension_numbers = #tpu.dot_dimension_numbers<[2], [2], [1], [1], [0, 0, 0, 1, 1, 1], [0], [0]>} : vector<2x8x16xf32>, vector<2x8x16xf32>, vector<2x8x8xf32> -> vector<2x8x8xf32>
    "tpu.trace_stop"() : () -> ()
    %9 = tpu.iota {dimensions = array<i32: 0>} : vector<8x8xi32>
    %10 = tpu.iota {dimensions = array<i32: 1>} : vector<8x8xi32>
    %11 = arith.cmpi sle, %10, %9 : vector<8x8xi32>
    %12 = vector.shape_cast %11 : vector<8x8xi1> to vector<1x8x8xi1>
    %cst_12 = arith.constant -1.000000e+30 : f32
    %13 = vector.shape_cast %12 : vector<1x8x8xi1> to vector<1x8x8xi1>
    %14 = vector.broadcast %13 : vector<1x8x8xi1> to vector<2x8x8xi1>
    %15 = vector.broadcast %cst_12 : f32 to vector<2x8x8xf32>
    %16 = arith.select %14, %8, %15 : vector<2x8x8xi1>, vector<2x8x8xf32>
    %cst_13 = arith.constant dense<0xFF800000> : vector<2x8xf32>
    %17 = vector.multi_reduction <maximumf>, %16, %cst_13 [2] : vector<2x8x8xf32> to vector<2x8xf32>
    %18 = vector.shape_cast %17 : vector<2x8xf32> to vector<2x8x1xf32>
    %19 = vector.broadcast %18 : vector<2x8x1xf32> to vector<2x8x8xf32>
    %20 = arith.subf %16, %19 : vector<2x8x8xf32>
    %21 = math.exp %20 : vector<2x8x8xf32>
    %cst_14 = arith.constant dense<0.000000e+00> : vector<2x8xf32>
    %22 = vector.multi_reduction <add>, %21, %cst_14 [2] : vector<2x8x8xf32> to vector<2x8xf32>
    %23 = vector.shape_cast %22 : vector<2x8xf32> to vector<2x8x1xf32>
    %24 = vector.broadcast %23 : vector<2x8x1xf32> to vector<2x8x8xf32>
    %25 = arith.divf %21, %24 : vector<2x8x8xf32>
    "tpu.trace_start"() <{level = 10 : i32, message = "hqk,hkd->hqd"}> : () -> ()
    %cst_15 = arith.constant dense<0.000000e+00> : vector<2x8x16xf32>
    %26 = tpu.matmul %25, %7, %cst_15 {dimension_numbers = #tpu.dot_dimension_numbers<[2], [1], [1], [2], [0, 0, 0, 1, 1, 2], [0], [0]>} : vector<2x8x8xf32>, vector<2x8x16xf32>, vector<2x8x16xf32> -> vector<2x8x16xf32>
    "tpu.trace_stop"() : () -> ()
    %c0_16 = arith.constant 0 : index
    %c0_17 = arith.constant 0 : index
    %c0_18 = arith.constant 0 : index
    %c0_19 = arith.constant 0 : index
    %27 = vector.load %arg4[%c0_16, %c0_17, %c0_18, %c0_19] : memref<1x2x8x16xf32, #tpu.memory_space<vmem>>, vector<1x2x8x16xf32>
    %28 = vector.shape_cast %27 : vector<1x2x8x16xf32> to vector<2x8x16xf32>
    %29 = vector.shape_cast %26 : vector<2x8x16xf32> to vector<1x2x8x16xf32>
    tpu.vector_store %arg4[%c0_16, %c0_17, %c0_18, %c0_19], %29 {strides = array<i32>} : memref<1x2x8x16xf32, #tpu.memory_space<vmem>>, vector<1x2x8x16xf32>,
    return
  }
  func.func @transform_0(%arg0: i32) -> (i32, i32, i32, i32) {
    %c0_i32 = arith.constant 0 : i32
    %c0_i32_0 = arith.constant 0 : i32
    %c0_i32_1 = arith.constant 0 : i32
    %c0_i32_2 = arith.constant 0 : i32
    return %arg0, %c0_i32, %c0_i32_0, %c0_i32_1 : i32, i32, i32, i32
  }
  func.func @transform_1(%arg0: i32) -> (i32, i32, i32, i32) {
    %c0_i32 = arith.constant 0 : i32
    %c0_i32_0 = arith.constant 0 : i32
    %c0_i32_1 = arith.constant 0 : i32
    %c0_i32_2 = arith.constant 0 : i32
    return %arg0, %c0_i32, %c0_i32_0, %c0_i32_1 : i32, i32, i32, i32
  }
  func.func @transform_2(%arg0: i32) -> (i32, i32, i32, i32) {
    %c0_i32 = arith.constant 0 : i32
    %c0_i32_0 = arith.constant 0 : i32
    %c0_i32_1 = arith.constant 0 : i32
    %c0_i32_2 = arith.constant 0 : i32
    return %arg0, %c0_i32, %c0_i32_0, %c0_i32_1 : i32, i32, i32, i32
  }
  func.func @transform_3(%arg0: i32) -> (i32, i32, i32, i32) {
    %c0_i32 = arith.constant 0 : i32
    %c0_i32_0 = arith.constant 0 : i32
    %c0_i32_1 = arith.constant 0 : i32
    %c0_i32_2 = arith.constant 0 : i32
    return %arg0, %c0_i32, %c0_i32_0, %c0_i32_1 : i32, i32, i32, i32
  }
}

module attributes {stable_mosaic.version = 11 : i64} {
  func.func @_matmul_kernel(%arg0: i32, %arg1: i32, %arg2: i32, %arg3: memref<16x128xf32, #tpu.memory_space<vmem>>, %arg4: memref<128x128xf32, #tpu.memory_space<vmem>>, %arg5: memref<1x128xf32, #tpu.memory_space<vmem>>, %arg6: memref<16x128xf32, #tpu.memory_space<vmem>>, %arg7: memref<16x128xf32, #tpu.memory_space<vmem>>, %arg8: memref<16x128xf32, #tpu.memory_space<vmem>>) attributes {dimension_semantics = [#tpu.dimension_semantics<parallel>, #tpu.dimension_semantics<parallel>, #tpu.dimension_semantics<arbitrary>], iteration_bounds = array<i64: 1, 1, 1>, scalar_prefetch = 0 : i64, scratch_operands = 1 : i64, tpu.core_type = #tpu.core_type<tc>, window_params = [{transform_indices = @transform_0, window_bounds = array<i64: 16, 128>}, {transform_indices = @transform_1, window_bounds = array<i64: 128, 128>}, {transform_indices = @transform_2, window_bounds = array<i64: 1, 128>}, {transform_indices = @transform_3, window_bounds = array<i64: 16, 128>}, {transform_indices = @transform_4, window_bounds = array<i64: 16, 128>}]} {
    %c0_i32 = arith.constant 0 : i32
    %0 = arith.cmpi eq, %arg2, %c0_i32 : i32
    %1 = arith.extui %0 : i1 to i32
    %c0_i32_0 = arith.constant 0 : i32
    %2 = arith.cmpi ne, %1, %c0_i32_0 : i32
    scf.if %2 {
      %cst_10 = arith.constant 0.000000e+00 : f32
      %12 = vector.broadcast %cst_10 : f32 to vector<16x128xf32>
      %c0_11 = arith.constant 0 : index
      %c0_12 = arith.constant 0 : index
      %13 = vector.load %arg8[%c0_11, %c0_12] : memref<16x128xf32, #tpu.memory_space<vmem>>, vector<16x128xf32>
      tpu.vector_store %arg8[%c0_11, %c0_12], %12 {strides = array<i32>} : memref<16x128xf32, #tpu.memory_space<vmem>>, vector<16x128xf32>,
    } else {
    }
    %c0 = arith.constant 0 : index
    %c0_1 = arith.constant 0 : index
    %3 = vector.load %arg8[%c0, %c0_1] : memref<16x128xf32, #tpu.memory_space<vmem>>, vector<16x128xf32>
    %c0_2 = arith.constant 0 : index
    %c0_3 = arith.constant 0 : index
    %4 = vector.load %arg3[%c0_2, %c0_3] : memref<16x128xf32, #tpu.memory_space<vmem>>, vector<16x128xf32>
    %c0_4 = arith.constant 0 : index
    %c0_5 = arith.constant 0 : index
    %5 = vector.load %arg4[%c0_4, %c0_5] : memref<128x128xf32, #tpu.memory_space<vmem>>, vector<128x128xf32>
    %cst = arith.constant dense<0.000000e+00> : vector<16x128xf32>
    %6 = tpu.matmul %4, %5, %cst {dimension_numbers = #tpu.dot_dimension_numbers<[1], [0], [0], [1], [0, 0, 1, 1], [], []>} : vector<16x128xf32>, vector<128x128xf32>, vector<16x128xf32> -> vector<16x128xf32>
    %7 = arith.addf %3, %6 : vector<16x128xf32>
    %c0_6 = arith.constant 0 : index
    %c0_7 = arith.constant 0 : index
    %8 = vector.load %arg8[%c0_6, %c0_7] : memref<16x128xf32, #tpu.memory_space<vmem>>, vector<16x128xf32>
    tpu.vector_store %arg8[%c0_6, %c0_7], %7 {strides = array<i32>} : memref<16x128xf32, #tpu.memory_space<vmem>>, vector<16x128xf32>,
    %c0_i32_8 = arith.constant 0 : i32
    %9 = arith.cmpi eq, %arg2, %c0_i32_8 : i32
    %10 = arith.extui %9 : i1 to i32
    %c0_i32_9 = arith.constant 0 : i32
    %11 = arith.cmpi ne, %10, %c0_i32_9 : i32
    scf.if %11 {
      %c0_10 = arith.constant 0 : index
      %c0_11 = arith.constant 0 : index
      %12 = vector.load %arg8[%c0_10, %c0_11] : memref<16x128xf32, #tpu.memory_space<vmem>>, vector<16x128xf32>
      %c0_12 = arith.constant 0 : index
      %c0_13 = arith.constant 0 : index
      %13 = vector.load %arg5[%c0_12, %c0_13] : memref<1x128xf32, #tpu.memory_space<vmem>>, vector<1x128xf32>
      %14 = vector.broadcast %13 : vector<1x128xf32> to vector<16x128xf32>
      %15 = arith.addf %12, %14 : vector<16x128xf32>
      %c0_14 = arith.constant 0 : index
      %c0_15 = arith.constant 0 : index
      %16 = vector.load %arg6[%c0_14, %c0_15] : memref<16x128xf32, #tpu.memory_space<vmem>>, vector<16x128xf32>
      %17 = arith.addf %15, %16 : vector<16x128xf32>
      %c0_16 = arith.constant 0 : index
      %c0_17 = arith.constant 0 : index
      %18 = vector.load %arg7[%c0_16, %c0_17] : memref<16x128xf32, #tpu.memory_space<vmem>>, vector<16x128xf32>
      tpu.vector_store %arg7[%c0_16, %c0_17], %17 {strides = array<i32>} : memref<16x128xf32, #tpu.memory_space<vmem>>, vector<16x128xf32>,
    } else {
    }
    return
  }
  func.func @transform_0(%arg0: i32, %arg1: i32, %arg2: i32) -> (i32, i32) {
    %c0_i32 = arith.constant 0 : i32
    return %arg0, %arg2 : i32, i32
  }
  func.func @transform_1(%arg0: i32, %arg1: i32, %arg2: i32) -> (i32, i32) {
    %c0_i32 = arith.constant 0 : i32
    return %arg2, %arg1 : i32, i32
  }
  func.func @transform_2(%arg0: i32, %arg1: i32, %arg2: i32) -> (i32, i32) {
    %c0_i32 = arith.constant 0 : i32
    %c0_i32_0 = arith.constant 0 : i32
    return %c0_i32, %arg1 : i32, i32
  }
  func.func @transform_3(%arg0: i32, %arg1: i32, %arg2: i32) -> (i32, i32) {
    %c0_i32 = arith.constant 0 : i32
    return %arg0, %arg1 : i32, i32
  }
  func.func @transform_4(%arg0: i32, %arg1: i32, %arg2: i32) -> (i32, i32) {
    %c0_i32 = arith.constant 0 : i32
    return %arg0, %arg1 : i32, i32
  }
}

module attributes {stable_mosaic.version = 11 : i64} {
  func.func @_matmul_kernel(%arg0: i32, %arg1: i32, %arg2: i32, %arg3: memref<16x128xf32, #tpu.memory_space<vmem>>, %arg4: memref<128x128xf32, #tpu.memory_space<vmem>>, %arg5: memref<1x128xf32, #tpu.memory_space<vmem>>, %arg6: memref<16x128xf32, #tpu.memory_space<vmem>>, %arg7: memref<16x128xf32, #tpu.memory_space<vmem>>) attributes {dimension_semantics = [#tpu.dimension_semantics<parallel>, #tpu.dimension_semantics<parallel>, #tpu.dimension_semantics<arbitrary>], iteration_bounds = array<i64: 1, 1, 1>, scalar_prefetch = 0 : i64, scratch_operands = 1 : i64, tpu.core_type = #tpu.core_type<tc>, window_params = [{transform_indices = @transform_0, window_bounds = array<i64: 16, 128>}, {transform_indices = @transform_1, window_bounds = array<i64: 128, 128>}, {transform_indices = @transform_2, window_bounds = array<i64: 1, 128>}, {transform_indices = @transform_3, window_bounds = array<i64: 16, 128>}]} {
    %c0_i32 = arith.constant 0 : i32
    %0 = arith.cmpi eq, %arg2, %c0_i32 : i32
    %1 = arith.extui %0 : i1 to i32
    %c0_i32_0 = arith.constant 0 : i32
    %2 = arith.cmpi ne, %1, %c0_i32_0 : i32
    scf.if %2 {
      %cst_10 = arith.constant 0.000000e+00 : f32
      %12 = vector.broadcast %cst_10 : f32 to vector<16x128xf32>
      %c0_11 = arith.constant 0 : index
      %c0_12 = arith.constant 0 : index
      %13 = vector.load %arg7[%c0_11, %c0_12] : memref<16x128xf32, #tpu.memory_space<vmem>>, vector<16x128xf32>
      tpu.vector_store %arg7[%c0_11, %c0_12], %12 {strides = array<i32>} : memref<16x128xf32, #tpu.memory_space<vmem>>, vector<16x128xf32>,
    } else {
    }
    %c0 = arith.constant 0 : index
    %c0_1 = arith.constant 0 : index
    %3 = vector.load %arg7[%c0, %c0_1] : memref<16x128xf32, #tpu.memory_space<vmem>>, vector<16x128xf32>
    %c0_2 = arith.constant 0 : index
    %c0_3 = arith.constant 0 : index
    %4 = vector.load %arg3[%c0_2, %c0_3] : memref<16x128xf32, #tpu.memory_space<vmem>>, vector<16x128xf32>
    %c0_4 = arith.constant 0 : index
    %c0_5 = arith.constant 0 : index
    %5 = vector.load %arg4[%c0_4, %c0_5] : memref<128x128xf32, #tpu.memory_space<vmem>>, vector<128x128xf32>
    %cst = arith.constant dense<0.000000e+00> : vector<16x128xf32>
    %6 = tpu.matmul %4, %5, %cst {dimension_numbers = #tpu.dot_dimension_numbers<[1], [0], [0], [1], [0, 0, 1, 1], [], []>} : vector<16x128xf32>, vector<128x128xf32>, vector<16x128xf32> -> vector<16x128xf32>
    %7 = arith.addf %3, %6 : vector<16x128xf32>
    %c0_6 = arith.constant 0 : index
    %c0_7 = arith.constant 0 : index
    %8 = vector.load %arg7[%c0_6, %c0_7] : memref<16x128xf32, #tpu.memory_space<vmem>>, vector<16x128xf32>
    tpu.vector_store %arg7[%c0_6, %c0_7], %7 {strides = array<i32>} : memref<16x128xf32, #tpu.memory_space<vmem>>, vector<16x128xf32>,
    %c0_i32_8 = arith.constant 0 : i32
    %9 = arith.cmpi eq, %arg2, %c0_i32_8 : i32
    %10 = arith.extui %9 : i1 to i32
    %c0_i32_9 = arith.constant 0 : i32
    %11 = arith.cmpi ne, %10, %c0_i32_9 : i32
    scf.if %11 {
      %c0_10 = arith.constant 0 : index
      %c0_11 = arith.constant 0 : index
      %12 = vector.load %arg7[%c0_10, %c0_11] : memref<16x128xf32, #tpu.memory_space<vmem>>, vector<16x128xf32>
      %c0_12 = arith.constant 0 : index
      %c0_13 = arith.constant 0 : index
      %13 = vector.load %arg5[%c0_12, %c0_13] : memref<1x128xf32, #tpu.memory_space<vmem>>, vector<1x128xf32>
      %14 = vector.broadcast %13 : vector<1x128xf32> to vector<16x128xf32>
      %15 = arith.addf %12, %14 : vector<16x128xf32>
      %cst_14 = arith.constant 1.702000e+00 : f32
      %16 = vector.broadcast %cst_14 : f32 to vector<16x128xf32>
      %17 = arith.mulf %16, %15 : vector<16x128xf32>
      %18 = arith.negf %17 : vector<16x128xf32>
      %19 = math.exp %18 : vector<16x128xf32>
      %cst_15 = arith.constant 1.000000e+00 : f32
      %20 = vector.broadcast %cst_15 : f32 to vector<16x128xf32>
      %21 = arith.addf %20, %19 : vector<16x128xf32>
      %22 = arith.divf %20, %21 : vector<16x128xf32>
      %23 = arith.mulf %15, %22 : vector<16x128xf32>
      %c0_16 = arith.constant 0 : index
      %c0_17 = arith.constant 0 : index
      %24 = vector.load %arg6[%c0_16, %c0_17] : memref<16x128xf32, #tpu.memory_space<vmem>>, vector<16x128xf32>
      tpu.vector_store %arg6[%c0_16, %c0_17], %23 {strides = array<i32>} : memref<16x128xf32, #tpu.memory_space<vmem>>, vector<16x128xf32>,
    } else {
    }
    return
  }
  func.func @transform_0(%arg0: i32, %arg1: i32, %arg2: i32) -> (i32, i32) {
    %c0_i32 = arith.constant 0 : i32
    return %arg0, %arg2 : i32, i32
  }
  func.func @transform_1(%arg0: i32, %arg1: i32, %arg2: i32) -> (i32, i32) {
    %c0_i32 = arith.constant 0 : i32
    return %arg2, %arg1 : i32, i32
  }
  func.func @transform_2(%arg0: i32, %arg1: i32, %arg2: i32) -> (i32, i32) {
    %c0_i32 = arith.constant 0 : i32
    %c0_i32_0 = arith.constant 0 : i32
    return %c0_i32, %arg1 : i32, i32
  }
  func.func @transform_3(%arg0: i32, %arg1: i32, %arg2: i32) -> (i32, i32) {
    %c0_i32 = arith.constant 0 : i32
    return %arg0, %arg1 : i32, i32
  }
}

module attributes {stable_mosaic.version = 11 : i64} {
  func.func @_matmul_kernel(%arg0: i32, %arg1: i32, %arg2: i32, %arg3: memref<8x128xf32, #tpu.memory_space<vmem>>, %arg4: memref<128x128xf32, #tpu.memory_space<vmem>>, %arg5: memref<1x128xf32, #tpu.memory_space<vmem>>, %arg6: memref<8x128xf32, #tpu.memory_space<vmem>>, %arg7: memref<8x128xf32, #tpu.memory_space<vmem>>) attributes {dimension_semantics = [#tpu.dimension_semantics<parallel>, #tpu.dimension_semantics<parallel>, #tpu.dimension_semantics<arbitrary>], iteration_bounds = array<i64: 1, 1, 1>, scalar_prefetch = 0 : i64, scratch_operands = 1 : i64, tpu.core_type = #tpu.core_type<tc>, window_params = [{transform_indices = @transform_0, window_bounds = array<i64: 8, 128>}, {transform_indices = @transform_1, window_bounds = array<i64: 128, 128>}, {transform_indices = @transform_2, window_bounds = array<i64: 1, 128>}, {transform_indices = @transform_3, window_bounds = array<i64: 8, 128>}]} {
    %c0_i32 = arith.constant 0 : i32
    %0 = arith.cmpi eq, %arg2, %c0_i32 : i32
    %1 = arith.extui %0 : i1 to i32
    %c0_i32_0 = arith.constant 0 : i32
    %2 = arith.cmpi ne, %1, %c0_i32_0 : i32
    scf.if %2 {
      %cst_10 = arith.constant 0.000000e+00 : f32
      %12 = vector.broadcast %cst_10 : f32 to vector<8x128xf32>
      %c0_11 = arith.constant 0 : index
      %c0_12 = arith.constant 0 : index
      %13 = vector.load %arg7[%c0_11, %c0_12] : memref<8x128xf32, #tpu.memory_space<vmem>>, vector<8x128xf32>
      tpu.vector_store %arg7[%c0_11, %c0_12], %12 {strides = array<i32>} : memref<8x128xf32, #tpu.memory_space<vmem>>, vector<8x128xf32>,
    } else {
    }
    %c0 = arith.constant 0 : index
    %c0_1 = arith.constant 0 : index
    %3 = vector.load %arg7[%c0, %c0_1] : memref<8x128xf32, #tpu.memory_space<vmem>>, vector<8x128xf32>
    %c0_2 = arith.constant 0 : index
    %c0_3 = arith.constant 0 : index
    %4 = vector.load %arg3[%c0_2, %c0_3] : memref<8x128xf32, #tpu.memory_space<vmem>>, vector<8x128xf32>
    %c0_4 = arith.constant 0 : index
    %c0_5 = arith.constant 0 : index
    %5 = vector.load %arg4[%c0_4, %c0_5] : memref<128x128xf32, #tpu.memory_space<vmem>>, vector<128x128xf32>
    %cst = arith.constant dense<0.000000e+00> : vector<8x128xf32>
    %6 = tpu.matmul %4, %5, %cst {dimension_numbers = #tpu.dot_dimension_numbers<[1], [0], [0], [1], [0, 0, 1, 1], [], []>} : vector<8x128xf32>, vector<128x128xf32>, vector<8x128xf32> -> vector<8x128xf32>
    %7 = arith.addf %3, %6 : vector<8x128xf32>
    %c0_6 = arith.constant 0 : index
    %c0_7 = arith.constant 0 : index
    %8 = vector.load %arg7[%c0_6, %c0_7] : memref<8x128xf32, #tpu.memory_space<vmem>>, vector<8x128xf32>
    tpu.vector_store %arg7[%c0_6, %c0_7], %7 {strides = array<i32>} : memref<8x128xf32, #tpu.memory_space<vmem>>, vector<8x128xf32>,
    %c0_i32_8 = arith.constant 0 : i32
    %9 = arith.cmpi eq, %arg2, %c0_i32_8 : i32
    %10 = arith.extui %9 : i1 to i32
    %c0_i32_9 = arith.constant 0 : i32
    %11 = arith.cmpi ne, %10, %c0_i32_9 : i32
    scf.if %11 {
      %c0_10 = arith.constant 0 : index
      %c0_11 = arith.constant 0 : index
      %12 = vector.load %arg7[%c0_10, %c0_11] : memref<8x128xf32, #tpu.memory_space<vmem>>, vector<8x128xf32>
      %c0_12 = arith.constant 0 : index
      %c0_13 = arith.constant 0 : index
      %13 = vector.load %arg5[%c0_12, %c0_13] : memref<1x128xf32, #tpu.memory_space<vmem>>, vector<1x128xf32>
      %14 = vector.broadcast %13 : vector<1x128xf32> to vector<8x128xf32>
      %15 = arith.addf %12, %14 : vector<8x128xf32>
      %c0_14 = arith.constant 0 : index
      %c0_15 = arith.constant 0 : index
      %16 = vector.load %arg6[%c0_14, %c0_15] : memref<8x128xf32, #tpu.memory_space<vmem>>, vector<8x128xf32>
      tpu.vector_store %arg6[%c0_14, %c0_15], %15 {strides = array<i32>} : memref<8x128xf32, #tpu.memory_space<vmem>>, vector<8x128xf32>,
    } else {
    }
    return
  }
  func.func @transform_0(%arg0: i32, %arg1: i32, %arg2: i32) -> (i32, i32) {
    %c0_i32 = arith.constant 0 : i32
    return %arg0, %arg2 : i32, i32
  }
  func.func @transform_1(%arg0: i32, %arg1: i32, %arg2: i32) -> (i32, i32) {
    %c0_i32 = arith.constant 0 : i32
    return %arg2, %arg1 : i32, i32
  }
  func.func @transform_2(%arg0: i32, %arg1: i32, %arg2: i32) -> (i32, i32) {
    %c0_i32 = arith.constant 0 : i32
    %c0_i32_0 = arith.constant 0 : i32
    return %c0_i32, %arg1 : i32, i32
  }
  func.func @transform_3(%arg0: i32, %arg1: i32, %arg2: i32) -> (i32, i32) {
    %c0_i32 = arith.constant 0 : i32
    return %arg0, %arg1 : i32, i32
  }
}

</mosaic_0001>

<bundles_post_ra>
// kernel: clip_text_encode.16
= control target key start
LH: loop header
LB: loop body
LE: loop exit
PB: predicated region body
PF: predicated region fallthrough
CT: control target
= control target key end

     0   :  { %vm16_vm0 = vcmask 261120   ;;  %s118_s0 = inlined_call_operand.vmem [shape: f32[16,32], index: 0, kind: input, shape index: {}]   ;;  %s119_s1 = inlined_call_operand.vmem [shape: f32[1,32], index: 1, kind: input, shape index: {}]   ;;  %s120_s2 = inlined_call_operand.vmem [shape: f32[1,32], index: 2, kind: input, shape index: {}]   ;;  %s121_s3 = inlined_call_operand.vmem [shape: f32[16,32], index: 3, kind: output, shape index: {}]  }
   0x1   :  { %v14_v0 = vld [vmem:[%s118_s0] sm:$0xff]  ;;  %v15_v1 = vld [vmem:[%s118_s0 + $0x8] sm:$0xff] }
   0x2   :  { %v17_v2 = vsel %vm16_vm0, %v14_v0, 0.0  ;;  %v20_v3 = vsel %vm16_vm0, %v15_v1, 0.0  ;;  %v68_v21 = vld [vmem:[%s119_s1] ss:$0 sm:$0xff] }
   0x3   :  { %18 = vadd.xlane.f32.xlu0 %v17_v2  ;;  %v69_v23 = vld [vmem:[%s120_s2] ss:$0 sm:$0xff] }
   0x7   :  { %21 = vadd.xlane.f32.xlu0 %v20_v3 }
  0x90   :  { %v19_v4 = vpop.xlane.xlu0 %18 }
  0x91   :  { %v24_v5 = vmul.f32 0.03125, %v19_v4 }
  0x93   :  { %v26_v6 = vsub.f32 %v14_v0, %v24_v5 }
  0x94   :  { %v22_v7 = vpop.xlane.xlu0 %21 }
  0x95   :  { %v25_v8 = vmul.f32 0.03125, %v22_v7  ;;  %v28_v9 = vmul.f32 %v26_v6, %v26_v6 }
  0x97   :  { %v27_v10 = vsub.f32 %v15_v1, %v25_v8  ;;  %v30_v11 = vsel %vm16_vm0, %v28_v9, 0.0 }
  0x98   :  { %31 = vadd.xlane.f32.xlu1 %v30_v11 }
  0x99   :  { %v29_v12 = vmul.f32 %v27_v10, %v27_v10 }
  0x9b   :  { %v33_v13 = vsel %vm16_vm0, %v29_v12, 0.0 }
  0x9c   :  { %34 = vadd.xlane.f32.xlu1 %v33_v13 }
 0x125   :  { %v32_v14 = vpop.xlane.xlu1 %31 }
 0x126   :  { %v36_v15 = vmul.f32 0.03125, %v32_v14 }
 0x128   :  { %v38_v16 = vadd.f32 1e-05, %v36_v15 }
 0x129   :  { %v35_v17 = vpop.xlane.xlu1 %34 }
 0x12a   :  { %70 = vrsqrt.f32 %v38_v16  ;;  %v37_v18 = vmul.f32 0.03125, %v35_v17 }
 0x12c   :  { %v39_v19 = vadd.f32 1e-05, %v37_v18 }
 0x12e   :  { %72 = vrsqrt.f32 %v39_v19 }
 0x134   :  { %v71_v20 = vpop.eup %70 }
 0x135   :  { %v42_v22 = vmul.f32 %v71_v20, %v26_v6 }
 0x137   :  { %v51_v24 = vmul.f32 %v68_v21, %v42_v22 }
 0x138   :  { %v73_v25 = vpop.eup %72 }
 0x139   :  { %v60_v26 = vadd.f32 %v69_v23, %v51_v24  ;;  %v43_v27 = vmul.f32 %v73_v25, %v27_v10 }
 0x13b   :  { %62 = vst.msk [vmem:[%s121_s3] sm:$0xff] %vm16_vm0, %v60_v26  ;;  %v52_v28 = vmul.f32 %v68_v21, %v43_v27 }
 0x13d   :  { %v61_v29 = vadd.f32 %v69_v23, %v52_v28 }
 0x13f   :  { %63 = vst.msk [vmem:[%s121_s3 + $0x8] sm:$0xff] %vm16_vm0, %v61_v29 }

// kernel: clip_text_encode.17
= control target key start
LH: loop header
LB: loop body
LE: loop exit
PB: predicated region body
PF: predicated region fallthrough
CT: control target
= control target key end

     0   :  { %s308_s1 = inlined_call_operand.vmem [shape: f32[128,128], index: 1, kind: input, shape index: {}]   ;;  %s309_s0 = inlined_call_operand.vmem [shape: f32[16,128], index: 0, kind: input, shape index: {}]   ;;  %s310_s2 = inlined_call_operand.vmem [shape: f32[1,128], index: 2, kind: input, shape index: {}]   ;;  %s311_s3 = inlined_call_operand.vmem [shape: f32[16,128], index: 3, kind: output, shape index: {}]  }
   0x1   :  { %v24_v0 = vld [vmem:[%s308_s1] sm:$0xff]  ;;  %v25_v1 = vld [vmem:[%s308_s1 + $0x8] sm:$0xff]  ;;  %v26_v2 = vld [vmem:[%s308_s1 + $0x10] sm:$0xff] }
   0x2   :  { %v193_v3 = vpack.c.bf16 %v25_v1, %v24_v0  ;;  %v27_v4 = vld [vmem:[%s308_s1 + $0x18] sm:$0xff]  ;;  %v28_v6 = vld [vmem:[%s308_s1 + $0x20] sm:$0xff]  ;;  %v29_v7 = vld [vmem:[%s308_s1 + $0x28] sm:$0xff] }
   0x3   :  { %v197_v5 = vpack.c.bf16 %v27_v4, %v26_v2  ;;  %v201_v8 = vpack.c.bf16 %v29_v7, %v28_v6  ;;  %v22_v9 = vld [vmem:[%s309_s0] sm:$0xff]  ;;  %v30_v10 = vld [vmem:[%s308_s1 + $0x30] sm:$0xff]  ;;  %v31_v11 = vld [vmem:[%s308_s1 + $0x38] sm:$0xff] }
   0x4   :  { %194 = vmatprep.subr.bf16.mxu0 %v193_v3  ;;  %190 = vmatprep.mubr.f32.mxu0 %v22_v9  ;;  %v205_v12 = vpack.c.bf16 %v31_v11, %v30_v10  ;;  %v32_v13 = vld [vmem:[%s308_s1 + $0x40] sm:$0xff]  ;;  %v33_v14 = vld [vmem:[%s308_s1 + $0x48] sm:$0xff]  ;;  %v34_v16 = vld [vmem:[%s308_s1 + $0x50] sm:$0xff] }
   0x5   :  { %196 = vmatpush3.bf16.msra.mxu0 %v193_v3  ;;  %v209_v15 = vpack.c.bf16 %v33_v14, %v32_v13  ;;  %v35_v17 = vld [vmem:[%s308_s1 + $0x58] sm:$0xff]  ;;  %v36_v19 = vld [vmem:[%s308_s1 + $0x60] sm:$0xff]  ;;  %v37_v20 = vld [vmem:[%s308_s1 + $0x68] sm:$0xff] }
   0x6   :  { %198 = vmatprep.subr.bf16.mxu0 %v197_v5  ;;  %v213_v18 = vpack.c.bf16 %v35_v17, %v34_v16  ;;  %v217_v21 = vpack.c.bf16 %v37_v20, %v36_v19  ;;  %v38_v22 = vld [vmem:[%s308_s1 + $0x70] sm:$0xff]  ;;  %v39_v23 = vld [vmem:[%s308_s1 + $0x78] sm:$0xff]  ;;  %v23_v25 = vld [vmem:[%s309_s0 + $0x8] sm:$0xff] }
   0x7   :  { %v221_v24 = vpack.c.bf16 %v39_v23, %v38_v22  ;;  %v139_v26 = vld [vmem:[%s310_s2] ss:$0 sm:$0xff] }
   0x9   :  { %200 = vmatpush3.bf16.msra.mxu0 %v197_v5 }
   0xa   :  { %202 = vmatprep.subr.bf16.mxu0 %v201_v8 }
   0xd   :  { %204 = vmatpush3.bf16.msra.mxu0 %v201_v8 }
   0xe   :  { %206 = vmatprep.subr.bf16.mxu0 %v205_v12 }
  0x11   :  { %208 = vmatpush3.bf16.msra.mxu0 %v205_v12 }
  0x12   :  { %210 = vmatprep.subr.bf16.mxu0 %v209_v15 }
  0x15   :  { %212 = vmatpush3.bf16.msra.mxu0 %v209_v15 }
  0x16   :  { %214 = vmatprep.subr.bf16.mxu0 %v213_v18 }
  0x19   :  { %216 = vmatpush3.bf16.msra.mxu0 %v213_v18 }
  0x1a   :  { %218 = vmatprep.subr.bf16.mxu0 %v217_v21 }
  0x1d   :  { %220 = vmatpush3.bf16.msra.mxu0 %v217_v21 }
  0x1e   :  { %222 = vmatprep.subr.bf16.mxu0 %v221_v24 }
  0x21   :  { %224 = vmatpush3.bf16.msra.mxu0 %v221_v24 }
  0x24   :  { %191 = vmatmul.mubr.f32.vlgmr.msra.gmra.mrb[0].mxu0 %v23_v25 }
  0xf7   :  { %v192_v27 = vpop.f32.mrb[0].mxu0 }
  0xf8   :  { %v132_v28 = vadd.f32 %v192_v27, %v139_v26  ;;  %v106_v29 = vpop.f32.mrb[1].mxu0 }
  0xf9   :  { %v131_v30 = vadd.f32 %v139_v26, %v106_v29 }
  0xfa   :  { %134 = vst [vmem:[%s311_s3 + $0x8] sm:$0xff] %v132_v28 }
  0xfb   :  { %133 = vst [vmem:[%s311_s3] sm:$0xff] %v131_v30 }

// kernel: clip_text_encode.18
= control target key start
LH: loop header
LB: loop body
LE: loop exit
PB: predicated region body
PF: predicated region fallthrough
CT: control target
= control target key end

     0   :  { %s732_s12 = smov 0   ;;  %s777_s0 = inlined_call_operand.vmem [shape: f32[2,2,8,16], index: 0, kind: input, shape index: {}]   ;;  %s778_s1 = inlined_call_operand.vmem [shape: f32[2,2,8,16], index: 1, kind: input, shape index: {}]   ;;  %s779_s2 = inlined_call_operand.vmem [shape: f32[2,2,8,16], index: 2, kind: input, shape index: {}]   ;;  %s780_s3 = inlined_call_operand.vmem [shape: f32[2,2,8,16], index: 3, kind: output, shape index: {}]  }
   0x1 LB: > { %s631_s13 = sadd.s32 4294967295, %s708_s12   ;;  %p635_p0 = scmp.ge.s32.totalorder %s708_s12, 1  ;;  %s708_s12 = sphi %s732_s12, %s13_s12  }
   0x2   : > { %p157_p1 = scmp.lt.s32.totalorder %s708_s12, 3 }
   0x4   : > { %p158_p2 = pnand %p635_p0, %p157_p1 }
   0x5   : > { %p191_p3 = scmp.lt.s32.totalorder (!%p158_p2), %s631_s13, 1  ;;  %v710_v0 = vmov (!%p158_p2), 0.0   ;;  %vm711_vm0 = vmmov (!%p158_p2), 0   ;;  %vm219_vm1 = vcmask (!%p158_p2), 130048   ;;  %v372_v7 = vlaneseq (!%p158_p2) }
   0x6   : > { %161 = sbr.rel (%p158_p2) target bundleno = 764 (0x2fc), region = 32  ;;  %664 = vmatprep.subr.mxu0 (!%p158_p2), %v710_v0  ;;  %666 = vmatprep.mubr.msk.f32.mxu0 (!%p158_p2), %vm711_vm0, %v710_v0  ;;  %vm381_vm3 = vcmask (!%p158_p2), 64512  }
   0x7   : > { %669 = vmatprep.subr.mxu1 (!%p158_p2), %v710_v0  ;;  %671 = vmatprep.mubr.msk.f32.mxu1 (!%p158_p2), %vm711_vm0, %v710_v0  ;;  %v373_v8 = vshrl.u32 (!%p158_p2), %v372_v7, 7  ;;  %v375_v9 = vand.u32 (!%p158_p2), 127, %v372_v7 }
   0x9   : > { %vm376_vm2 = vcmp.le.s32.totalorder (!%p158_p2), %v375_v9, %v373_v8 }
   0xd   : > { %s782_s13 = smov (!%p191_p3, %s631_s13), 1 }
   0xe   : > { %s742_s14 = sshll.u32 %s782_s13, 4 }
   0xf   : > { %s200_s17 = scalar_lea.vmem %s778_s1, %s742_s14  ;;  %s195_s20 = scalar_lea.vmem %s777_s0, %s742_s14 }
  0x10   : > { %v215_v1 = vld [vmem:[%s200_s17] sm:$0xff]  ;;  %v216_v3 = vld [vmem:[%s200_s17 + $0x8] sm:$0xff]  ;;  %s205_s23 = scalar_lea.vmem %s779_s2, %s742_s14  ;;  %s210_s26 = scalar_lea.vmem %s780_s3, %s742_s14 }
  0x11   : > { %v211_v2 = vld [vmem:[%s195_s20] sm:$0xff]  ;;  %665 = vmatpush3.xpose.msk.msra.mxu0 %vm219_vm1, %v215_v1  ;;  %670 = vmatpush3.xpose.msk.msra.mxu1 %vm219_vm1, %v216_v3  ;;  %v212_v5 = vld [vmem:[%s195_s20 + $0x8] sm:$0xff] }
  0x12   : > { %v213_v4 = vmul.f32 0.25, %v211_v2  ;;  %v214_v6 = vmul.f32 0.25, %v212_v5  ;;  %674 = vmatprep.subr.mxu0 %v710_v0  ;;  %679 = vmatprep.subr.mxu1 %v710_v0  ;;  %v217_v28 = vld [vmem:[%s205_s23] sm:$0xff]  ;;  %v218_v29 = vld [vmem:[%s205_s23 + $0x8] sm:$0xff] }
  0x14   : > { %667 = vmatmul.mubr.msk.f32.vlgmr.msra.gmra.mrb[0].mxu0 %vm219_vm1, %v213_v4  ;;  %672 = vmatmul.mubr.msk.f32.vlgmr.msra.gmra.mrb[0].mxu1 %vm219_vm1, %v214_v6 }
  0x15   : > { %676 = vmatprep.mubr.msk.f32.mxu0 %vm711_vm0, %v710_v0  ;;  %681 = vmatprep.mubr.msk.f32.mxu1 %vm711_vm0, %v710_v0 }
  0x16   : > { %675 = vmatpush3.msra.mxu0 %v217_v28  ;;  %680 = vmatpush3.msra.mxu1 %v218_v29 }
  0xe7   : > { %v292_v10 = vpop.f32.mrb[0].mxu0  ;;  %v368_v11 = vpop.f32.mrb[0].mxu1 }
  0xe8   : > { %v379_v12 = vsel %vm376_vm2, %v292_v10, -1e+30  ;;  %v668_v13 = vpop.f32.mrb[1].mxu0  ;;  %v380_v14 = vsel %vm376_vm2, %v368_v11, -1e+30  ;;  %v673_v15 = vpop.f32.mrb[1].mxu1 }
  0xe9   : > { %v382_v16 = vsel %vm381_vm3, %v379_v12, -inf  ;;  %v385_v17 = vsel %vm381_vm3, %v380_v14, -inf }
  0xea   : > { %383 = vmax.xlane.f32.xlu0 %v382_v16 }
  0xee   : > { %386 = vmax.xlane.f32.xlu0 %v385_v17 }
 0x177   : > { %v384_v18 = vpop.xlane.xlu0 %383 }
 0x178   : > { %v388_v19 = vsub.f32 %v379_v12, %v384_v18 }
 0x17a   : > { %v390_v20 = vmul.f32 1.442695, %v388_v19 }
 0x17b   : > { %v387_v21 = vpop.xlane.xlu0 %386 }
 0x17c   : > { %694 = vpow2.f32 %v390_v20  ;;  %v389_v22 = vsub.f32 %v380_v14, %v387_v21 }
 0x17e   : > { %v392_v23 = vmul.f32 1.442695, %v389_v22 }
 0x180   : > { %696 = vpow2.f32 %v392_v23 }
 0x186   : > { %v695_v24 = vpop.eup %694 }
 0x187   : > { %v394_v25 = vsel %vm381_vm3, %v695_v24, 0.0 }
 0x188   : > { %395 = vadd.xlane.f32.xlu1 %v394_v25 }
 0x18a   : > { %v697_v26 = vpop.eup %696 }
 0x18b   : > { %v397_v27 = vsel %vm381_vm3, %v697_v26, 0.0 }
 0x18c   : > { %398 = vadd.xlane.f32.xlu1 %v397_v27 }
 0x215   : > { %v396_v30 = vpop.xlane.xlu1 %395 }
 0x216   : > { %698 = vrcp.f32 %v396_v30 }
 0x219   : > { %v399_v31 = vpop.xlane.xlu1 %398 }
 0x21a   : > { %700 = vrcp.f32 %v399_v31 }
 0x220   : > { %v699_v32 = vpop.eup %698 }
 0x221   : > { %v401_v33 = vmul.f32 %v699_v32, %v695_v24 }
 0x223   : > { %677 = vmatmul.mubr.msk.f32.vlgmr.msra.gmra.mrb[2].mxu0 %vm381_vm3, %v401_v33 }
 0x224   : > { %v701_v34 = vpop.eup %700 }
 0x225   : > { %v403_v35 = vmul.f32 %v701_v34, %v697_v26 }
 0x227   : > { %682 = vmatmul.mubr.msk.f32.vlgmr.msra.gmra.mrb[2].mxu1 %vm381_vm3, %v403_v35 }
 0x2f6   : > { %v473_v36 = vpop.f32.mrb[2].mxu0 }
 0x2f7   : > { %550 = vst.msk [vmem:[%s210_s26] sm:$0xff] %vm219_vm1, %v473_v36  ;;  %v678_v37 = vpop.f32.mrb[3].mxu0 }
 0x2fa   : > { %v546_v38 = vpop.f32.mrb[2].mxu1 }
 0x2fb   : > { %551 = vst.msk [vmem:[%s210_s26 + $0x8] sm:$0xff] %vm219_vm1, %v546_v38  ;;  %v683_v39 = vpop.f32.mrb[3].mxu1 }
 0x2fc PF: > { %s13_s12 = sadd.s32 1, %s708_s12  }
 0x2fd   : > { %p10_p4 = scmp.ge.s32.totalorder %s13_s12, 4  }
 0x2ff   :  { %12 = sbr.rel (!%p10_p4) target bundleno = 1 (0x1), region = 68 }

// kernel: clip_text_encode.19
= control target key start
LH: loop header
LB: loop body
LE: loop exit
PB: predicated region body
PF: predicated region fallthrough
CT: control target
= control target key end

     0   :  { %s326_s1 = inlined_call_operand.vmem [shape: f32[128,128], index: 1, kind: input, shape index: {}]   ;;  %s327_s0 = inlined_call_operand.vmem [shape: f32[16,128], index: 0, kind: input, shape index: {}]   ;;  %s328_s2 = inlined_call_operand.vmem [shape: f32[1,128], index: 2, kind: input, shape index: {}]   ;;  %s329_s3 = inlined_call_operand.vmem [shape: f32[16,128], index: 3, kind: input, shape index: {}]   ;;  %s330_s4 = inlined_call_operand.vmem [shape: f32[16,128], index: 4, kind: output, shape index: {}]  }
   0x1   :  { %v27_v0 = vld [vmem:[%s326_s1] sm:$0xff]  ;;  %v28_v1 = vld [vmem:[%s326_s1 + $0x8] sm:$0xff]  ;;  %v29_v2 = vld [vmem:[%s326_s1 + $0x10] sm:$0xff] }
   0x2   :  { %v200_v3 = vpack.c.bf16 %v28_v1, %v27_v0  ;;  %v30_v4 = vld [vmem:[%s326_s1 + $0x18] sm:$0xff]  ;;  %v31_v6 = vld [vmem:[%s326_s1 + $0x20] sm:$0xff]  ;;  %v32_v7 = vld [vmem:[%s326_s1 + $0x28] sm:$0xff] }
   0x3   :  { %v204_v5 = vpack.c.bf16 %v30_v4, %v29_v2  ;;  %v208_v8 = vpack.c.bf16 %v32_v7, %v31_v6  ;;  %v25_v9 = vld [vmem:[%s327_s0] sm:$0xff]  ;;  %v33_v10 = vld [vmem:[%s326_s1 + $0x30] sm:$0xff]  ;;  %v34_v11 = vld [vmem:[%s326_s1 + $0x38] sm:$0xff] }
   0x4   :  { %201 = vmatprep.subr.bf16.mxu0 %v200_v3  ;;  %197 = vmatprep.mubr.f32.mxu0 %v25_v9  ;;  %v212_v12 = vpack.c.bf16 %v34_v11, %v33_v10  ;;  %v35_v13 = vld [vmem:[%s326_s1 + $0x40] sm:$0xff]  ;;  %v36_v14 = vld [vmem:[%s326_s1 + $0x48] sm:$0xff]  ;;  %v37_v16 = vld [vmem:[%s326_s1 + $0x50] sm:$0xff] }
   0x5   :  { %203 = vmatpush3.bf16.msra.mxu0 %v200_v3  ;;  %v216_v15 = vpack.c.bf16 %v36_v14, %v35_v13  ;;  %v38_v17 = vld [vmem:[%s326_s1 + $0x58] sm:$0xff]  ;;  %v39_v19 = vld [vmem:[%s326_s1 + $0x60] sm:$0xff]  ;;  %v40_v20 = vld [vmem:[%s326_s1 + $0x68] sm:$0xff] }
   0x6   :  { %205 = vmatprep.subr.bf16.mxu0 %v204_v5  ;;  %v220_v18 = vpack.c.bf16 %v38_v17, %v37_v16  ;;  %v224_v21 = vpack.c.bf16 %v40_v20, %v39_v19  ;;  %v41_v22 = vld [vmem:[%s326_s1 + $0x70] sm:$0xff]  ;;  %v42_v23 = vld [vmem:[%s326_s1 + $0x78] sm:$0xff]  ;;  %v26_v25 = vld [vmem:[%s327_s0 + $0x8] sm:$0xff] }
   0x7   :  { %v228_v24 = vpack.c.bf16 %v42_v23, %v41_v22  ;;  %v146_v26 = vld [vmem:[%s328_s2] ss:$0 sm:$0xff]  ;;  %v137_v28 = vld [vmem:[%s329_s3 + $0x8] sm:$0xff] }
   0x8   :  { %v136_v31 = vld [vmem:[%s329_s3] sm:$0xff] }
   0x9   :  { %207 = vmatpush3.bf16.msra.mxu0 %v204_v5 }
   0xa   :  { %209 = vmatprep.subr.bf16.mxu0 %v208_v8 }
   0xd   :  { %211 = vmatpush3.bf16.msra.mxu0 %v208_v8 }
   0xe   :  { %213 = vmatprep.subr.bf16.mxu0 %v212_v12 }
  0x11   :  { %215 = vmatpush3.bf16.msra.mxu0 %v212_v12 }
  0x12   :  { %217 = vmatprep.subr.bf16.mxu0 %v216_v15 }
  0x15   :  { %219 = vmatpush3.bf16.msra.mxu0 %v216_v15 }
  0x16   :  { %221 = vmatprep.subr.bf16.mxu0 %v220_v18 }
  0x19   :  { %223 = vmatpush3.bf16.msra.mxu0 %v220_v18 }
  0x1a   :  { %225 = vmatprep.subr.bf16.mxu0 %v224_v21 }
  0x1d   :  { %227 = vmatpush3.bf16.msra.mxu0 %v224_v21 }
  0x1e   :  { %229 = vmatprep.subr.bf16.mxu0 %v228_v24 }
  0x21   :  { %231 = vmatpush3.bf16.msra.mxu0 %v228_v24 }
  0x24   :  { %198 = vmatmul.mubr.f32.vlgmr.msra.gmra.mrb[0].mxu0 %v26_v25 }
  0xf7   :  { %v199_v27 = vpop.f32.mrb[0].mxu0 }
  0xf8   :  { %v135_v29 = vadd.f32 %v199_v27, %v146_v26  ;;  %v109_v30 = vpop.f32.mrb[1].mxu0 }
  0xf9   :  { %v134_v32 = vadd.f32 %v146_v26, %v109_v30 }
  0xfa   :  { %v139_v33 = vadd.f32 %v137_v28, %v135_v29 }
  0xfb   :  { %v138_v34 = vadd.f32 %v136_v31, %v134_v32 }
  0xfc   :  { %141 = vst [vmem:[%s330_s4 + $0x8] sm:$0xff] %v139_v33 }
  0xfd   :  { %140 = vst [vmem:[%s330_s4] sm:$0xff] %v138_v34 }

// kernel: clip_text_encode.21
= control target key start
LH: loop header
LB: loop body
LE: loop exit
PB: predicated region body
PF: predicated region fallthrough
CT: control target
= control target key end

     0   :  { %s334_s1 = inlined_call_operand.vmem [shape: f32[128,128], index: 1, kind: input, shape index: {}]   ;;  %s335_s0 = inlined_call_operand.vmem [shape: f32[16,128], index: 0, kind: input, shape index: {}]   ;;  %s336_s2 = inlined_call_operand.vmem [shape: f32[1,128], index: 2, kind: input, shape index: {}]   ;;  %s337_s3 = inlined_call_operand.vmem [shape: f32[16,128], index: 3, kind: output, shape index: {}]  }
   0x1   :  { %v24_v0 = vld [vmem:[%s334_s1] sm:$0xff]  ;;  %v25_v1 = vld [vmem:[%s334_s1 + $0x8] sm:$0xff]  ;;  %v26_v2 = vld [vmem:[%s334_s1 + $0x10] sm:$0xff] }
   0x2   :  { %v211_v3 = vpack.c.bf16 %v25_v1, %v24_v0  ;;  %v27_v4 = vld [vmem:[%s334_s1 + $0x18] sm:$0xff]  ;;  %v28_v6 = vld [vmem:[%s334_s1 + $0x20] sm:$0xff]  ;;  %v29_v7 = vld [vmem:[%s334_s1 + $0x28] sm:$0xff] }
   0x3   :  { %v215_v5 = vpack.c.bf16 %v27_v4, %v26_v2  ;;  %v219_v8 = vpack.c.bf16 %v29_v7, %v28_v6  ;;  %v22_v9 = vld [vmem:[%s335_s0] sm:$0xff]  ;;  %v30_v10 = vld [vmem:[%s334_s1 + $0x30] sm:$0xff]  ;;  %v31_v11 = vld [vmem:[%s334_s1 + $0x38] sm:$0xff] }
   0x4   :  { %212 = vmatprep.subr.bf16.mxu0 %v211_v3  ;;  %208 = vmatprep.mubr.f32.mxu0 %v22_v9  ;;  %v223_v12 = vpack.c.bf16 %v31_v11, %v30_v10  ;;  %v32_v13 = vld [vmem:[%s334_s1 + $0x40] sm:$0xff]  ;;  %v33_v14 = vld [vmem:[%s334_s1 + $0x48] sm:$0xff]  ;;  %v34_v16 = vld [vmem:[%s334_s1 + $0x50] sm:$0xff] }
   0x5   :  { %214 = vmatpush3.bf16.msra.mxu0 %v211_v3  ;;  %v227_v15 = vpack.c.bf16 %v33_v14, %v32_v13  ;;  %v35_v17 = vld [vmem:[%s334_s1 + $0x58] sm:$0xff]  ;;  %v36_v19 = vld [vmem:[%s334_s1 + $0x60] sm:$0xff]  ;;  %v37_v20 = vld [vmem:[%s334_s1 + $0x68] sm:$0xff] }
   0x6   :  { %216 = vmatprep.subr.bf16.mxu0 %v215_v5  ;;  %v231_v18 = vpack.c.bf16 %v35_v17, %v34_v16  ;;  %v235_v21 = vpack.c.bf16 %v37_v20, %v36_v19  ;;  %v38_v22 = vld [vmem:[%s334_s1 + $0x70] sm:$0xff]  ;;  %v39_v23 = vld [vmem:[%s334_s1 + $0x78] sm:$0xff]  ;;  %v23_v25 = vld [vmem:[%s335_s0 + $0x8] sm:$0xff] }
   0x7   :  { %v239_v24 = vpack.c.bf16 %v39_v23, %v38_v22  ;;  %v155_v26 = vld [vmem:[%s336_s2] ss:$0 sm:$0xff] }
   0x9   :  { %218 = vmatpush3.bf16.msra.mxu0 %v215_v5 }
   0xa   :  { %220 = vmatprep.subr.bf16.mxu0 %v219_v8 }
   0xd   :  { %222 = vmatpush3.bf16.msra.mxu0 %v219_v8 }
   0xe   :  { %224 = vmatprep.subr.bf16.mxu0 %v223_v12 }
  0x11   :  { %226 = vmatpush3.bf16.msra.mxu0 %v223_v12 }
  0x12   :  { %228 = vmatprep.subr.bf16.mxu0 %v227_v15 }
  0x15   :  { %230 = vmatpush3.bf16.msra.mxu0 %v227_v15 }
  0x16   :  { %232 = vmatprep.subr.bf16.mxu0 %v231_v18 }
  0x19   :  { %234 = vmatpush3.bf16.msra.mxu0 %v231_v18 }
  0x1a   :  { %236 = vmatprep.subr.bf16.mxu0 %v235_v21 }
  0x1d   :  { %238 = vmatpush3.bf16.msra.mxu0 %v235_v21 }
  0x1e   :  { %240 = vmatprep.subr.bf16.mxu0 %v239_v24 }
  0x21   :  { %242 = vmatpush3.bf16.msra.mxu0 %v239_v24 }
  0x24   :  { %209 = vmatmul.mubr.f32.vlgmr.msra.gmra.mrb[0].mxu0 %v23_v25 }
  0xf7   :  { %v210_v27 = vpop.f32.mrb[0].mxu0 }
  0xf8   :  { %v132_v28 = vadd.f32 %v210_v27, %v155_v26  ;;  %v106_v29 = vpop.f32.mrb[1].mxu0 }
  0xf9   :  { %v131_v30 = vadd.f32 %v155_v26, %v106_v29 }
  0xfa   :  { %v157_v31 = vmul.f32 -1.702, %v132_v28 }
  0xfb   :  { %v156_v32 = vmul.f32 -1.702, %v131_v30 }
  0xfc   :  { %v139_v33 = vmul.f32 1.442695, %v157_v31 }
  0xfd   :  { %v137_v34 = vmul.f32 1.442695, %v156_v32 }
  0xfe   :  { %243 = vpow2.f32 %v139_v33 }
  0xff   :  { %245 = vpow2.f32 %v137_v34 }
 0x108   :  { %v244_v35 = vpop.eup %243 }
 0x109   :  { %v246_v36 = vpop.eup %245  ;;  %v142_v37 = vadd.f32 1.0, %v244_v35 }
 0x10a   :  { %v141_v38 = vadd.f32 1.0, %v246_v36 }
 0x10b   :  { %247 = vrcp.f32 %v142_v37 }
 0x10c   :  { %249 = vrcp.f32 %v141_v38 }
 0x115   :  { %v248_v39 = vpop.eup %247 }
 0x116   :  { %v250_v40 = vpop.eup %249  ;;  %v148_v41 = vmul.f32 %v248_v39, %v132_v28 }
 0x117   :  { %v147_v42 = vmul.f32 %v250_v40, %v131_v30 }
 0x118   :  { %150 = vst [vmem:[%s337_s3 + $0x8] sm:$0xff] %v148_v41 }
 0x119   :  { %149 = vst [vmem:[%s337_s3] sm:$0xff] %v147_v42 }

// kernel: clip_text_encode.31
= control target key start
LH: loop header
LB: loop body
LE: loop exit
PB: predicated region body
PF: predicated region fallthrough
CT: control target
= control target key end

     0   :  { %v206_v0 = vmov 0.0|0.0   ;;  %vm207_vm0 = vmmov 0   ;;  %v208_v4 = vmov 0.0   ;;  %s286_s1 = inlined_call_operand.vmem [shape: f32[128,128], index: 1, kind: input, shape index: {}]   ;;  %s287_s0 = inlined_call_operand.vmem [shape: f32[8,128], index: 0, kind: input, shape index: {}]   ;;  %s288_s2 = inlined_call_operand.vmem [shape: f32[1,128], index: 2, kind: input, shape index: {}]   ;;  %s289_s3 = inlined_call_operand.vmem [shape: f32[8,128], index: 3, kind: output, shape index: {}]  }
   0x1   :  { %179 = vmatprep.subr.bf16.mxu0 %v206_v0  ;;  %v21_v1 = vld [vmem:[%s286_s1] sm:$0xff]  ;;  %v22_v2 = vld [vmem:[%s286_s1 + $0x8] sm:$0xff]  ;;  %v23_v3 = vld [vmem:[%s286_s1 + $0x10] sm:$0xff]  ;;  %176 = vmatprep.mubr.msk.f32.mxu0 %vm207_vm0, %v208_v4 }
   0x2   :  { %v180_v5 = vpack.c.bf16 %v22_v2, %v21_v1  ;;  %v24_v6 = vld [vmem:[%s286_s1 + $0x18] sm:$0xff]  ;;  %v25_v8 = vld [vmem:[%s286_s1 + $0x20] sm:$0xff]  ;;  %v26_v9 = vld [vmem:[%s286_s1 + $0x28] sm:$0xff] }
   0x3   :  { %v183_v7 = vpack.c.bf16 %v24_v6, %v23_v3  ;;  %v186_v10 = vpack.c.bf16 %v26_v9, %v25_v8  ;;  %v27_v11 = vld [vmem:[%s286_s1 + $0x30] sm:$0xff]  ;;  %v28_v12 = vld [vmem:[%s286_s1 + $0x38] sm:$0xff]  ;;  %v29_v14 = vld [vmem:[%s286_s1 + $0x40] sm:$0xff] }
   0x4   :  { %181 = vmatpush3.bf16.msra.mxu0 %v180_v5  ;;  %v189_v13 = vpack.c.bf16 %v28_v12, %v27_v11  ;;  %v30_v15 = vld [vmem:[%s286_s1 + $0x48] sm:$0xff]  ;;  %v31_v17 = vld [vmem:[%s286_s1 + $0x50] sm:$0xff]  ;;  %v32_v18 = vld [vmem:[%s286_s1 + $0x58] sm:$0xff] }
   0x5   :  { %182 = vmatprep.subr.bf16.mxu0 %v206_v0  ;;  %v192_v16 = vpack.c.bf16 %v30_v15, %v29_v14  ;;  %v195_v19 = vpack.c.bf16 %v32_v18, %v31_v17  ;;  %v33_v20 = vld [vmem:[%s286_s1 + $0x60] sm:$0xff]  ;;  %v34_v21 = vld [vmem:[%s286_s1 + $0x68] sm:$0xff]  ;;  %v35_v23 = vld [vmem:[%s286_s1 + $0x70] sm:$0xff] }
   0x6   :  { %v198_v22 = vpack.c.bf16 %v34_v21, %v33_v20  ;;  %v36_v24 = vld [vmem:[%s286_s1 + $0x78] sm:$0xff]  ;;  %v20_v26 = vld [vmem:[%s287_s0] sm:$0xff] }
   0x7   :  { %v201_v25 = vpack.c.bf16 %v36_v24, %v35_v23  ;;  %v126_v27 = vld [vmem:[%s288_s2] ss:$0 sm:$0xff] }
   0x8   :  { %184 = vmatpush3.bf16.msra.mxu0 %v183_v7 }
   0x9   :  { %185 = vmatprep.subr.bf16.mxu0 %v206_v0 }
   0xc   :  { %187 = vmatpush3.bf16.msra.mxu0 %v186_v10 }
   0xd   :  { %188 = vmatprep.subr.bf16.mxu0 %v206_v0 }
  0x10   :  { %190 = vmatpush3.bf16.msra.mxu0 %v189_v13 }
  0x11   :  { %191 = vmatprep.subr.bf16.mxu0 %v206_v0 }
  0x14   :  { %193 = vmatpush3.bf16.msra.mxu0 %v192_v16 }
  0x15   :  { %194 = vmatprep.subr.bf16.mxu0 %v206_v0 }
  0x18   :  { %196 = vmatpush3.bf16.msra.mxu0 %v195_v19 }
  0x19   :  { %197 = vmatprep.subr.bf16.mxu0 %v206_v0 }
  0x1c   :  { %199 = vmatpush3.bf16.msra.mxu0 %v198_v22 }
  0x1d   :  { %200 = vmatprep.subr.bf16.mxu0 %v206_v0 }
  0x20   :  { %202 = vmatpush3.bf16.msra.mxu0 %v201_v25 }
  0x23   :  { %177 = vmatmul.mubr.f32.vlgmr.msra.gmra.mrb[0].mxu0 %v20_v26 }
  0xf6   :  { %v103_v28 = vpop.f32.mrb[0].mxu0 }
  0xf7   :  { %v120_v29 = vadd.f32 %v126_v27, %v103_v28  ;;  %v178_v30 = vpop.f32.mrb[1].mxu0 }
  0xf9   :  { %121 = vst [vmem:[%s289_s3] sm:$0xff] %v120_v29 }

</bundles_post_ra>
